<compile_context>
chip_gen: v7x
topology: tpu7x:2x2x1
jax: 0.10.0
libtpu: 0.0.40
codegen_flags: <defaults>
</compile_context>

<pallas_src>
import math

import jax
import jax.numpy as jnp
import numpy as np
from jax.experimental import pallas as pl
from jax.experimental.pallas import tpu as pltpu


def _round_up(x, m):
    return (x + m - 1) // m * m


# ----------------------------- Pallas conv kernel -----------------------------
def _conv_mm_kernel(x_ref, w_ref, o_ref):
    """One (M-tile, K-tile) grid step: o += X_tile @ W_tile on the MXU.

    The output block index is constant across the last ("arbitrary") grid axis,
    so o_ref stays resident in VMEM and serves directly as the f32 accumulator.
    """
    k = pl.program_id(1)

    @pl.when(k == 0)
    def _():
        o_ref[...] = jnp.zeros_like(o_ref)

    o_ref[...] += jnp.dot(x_ref[...], w_ref[...],
                          preferred_element_type=jnp.float32)


def conv2d_pallas(x_nchw, w_oihw, padding=0, groups=1):
    """2D convolution (PyTorch conv2d semantics, bias=None) via Pallas."""
    assert groups == 1, "this instantiation uses groups=1"
    N, Ci, H, W = x_nchw.shape
    Co, Ci_w, K, K2 = w_oihw.shape
    assert Ci_w == Ci and K == K2
    if padding:
        x_nchw = jnp.pad(
            x_nchw, ((0, 0), (0, 0), (padding, padding), (padding, padding)))
        H += 2 * padding
        W += 2 * padding
    Ho, Wo = H - K + 1, W - K + 1
    M = N * Ho * Wo
    Kdim = K * K * Ci

    # ---- tile sizing (MXU/lane friendly, VMEM bounded) ----
    Co_pad = _round_up(Co, 128)                  # lane-dense output stores
    Kdim_pad = _round_up(Kdim, 128)              # 128-aligned contraction depth
    TK = Kdim_pad if Kdim_pad <= 2048 else 2048  # whole contraction if it fits
    Kdim_pad = _round_up(Kdim_pad, TK)
    TM = min(512, _round_up(M, 128))             # 128..512 output rows per tile
    M_pad = _round_up(M, TM)

    # ---- glue: im2col layout transform (no FLOPs here), bf16 operands ----
    # TODO(synk): for large inputs, replace the K*K-replicated im2col slab with
    # shifted-window (halo-reuse) DMA from the padded NHWC input held in HBM;
    # at this module's sizes the slab is tiny so the simple form is kept.
    x_nhwc = jnp.transpose(x_nchw, (0, 2, 3, 1))              # (N, H, W, Ci)
    patches = jnp.concatenate(
        [x_nhwc[:, kh:kh + Ho, kw:kw + Wo, :]
         for kh in range(K) for kw in range(K)],
        axis=-1).reshape(M, Kdim)                             # (M, K*K*Ci)
    x2 = jnp.pad(patches, ((0, M_pad - M), (0, Kdim_pad - Kdim)))
    x2 = x2.astype(jnp.bfloat16)

    w2 = jnp.transpose(w_oihw, (2, 3, 1, 0)).reshape(Kdim, Co)  # (K*K*Ci, Co)
    w2 = jnp.pad(w2, ((0, Kdim_pad - Kdim), (0, Co_pad - Co)))
    w2 = w2.astype(jnp.bfloat16)

    num_m = M_pad // TM
    num_k = Kdim_pad // TK
    cost = pl.CostEstimate(
        flops=2 * M_pad * Kdim_pad * Co_pad,
        transcendentals=0,
        bytes_accessed=(x2.size * 2 + w2.size * 2 + M_pad * Co_pad * 4))

    # ---- Pallas: all multiply-accumulate happens here ----
    out2d = pl.pallas_call(
        _conv_mm_kernel,
        out_shape=jax.ShapeDtypeStruct((M_pad, Co_pad), jnp.float32),
        grid_spec=pltpu.PrefetchScalarGridSpec(
            num_scalar_prefetch=0,
            grid=(num_m, num_k),                  # reduction axis last
            in_specs=[
                pl.BlockSpec((TM, TK), lambda i, k: (i, k)),
                pl.BlockSpec((TK, Co_pad), lambda i, k: (k, 0)),
            ],
            out_specs=pl.BlockSpec((TM, Co_pad), lambda i, k: (i, 0)),
        ),
        compiler_params=pltpu.CompilerParams(
            dimension_semantics=("parallel", "arbitrary"),
            vmem_limit_bytes=32 * 1024 * 1024),
        cost_estimate=cost,
    )(x2, w2)

    out = out2d[:M, :Co].reshape(N, Ho, Wo, Co)
    return jnp.transpose(out, (0, 3, 1, 2))       # NCHW at the module boundary


# -------------------- parameter setup glue (plain JAX) ------------------------
def make_rot_mats(rotations):
    deg = np.arange(0, 360, 360 // rotations).astype(np.float32)
    th = deg * np.pi / 180.0
    c, s = np.cos(th), np.sin(th)
    rot = np.zeros((rotations, 2, 3), np.float32)
    rot[:, 0, 0] = c
    rot[:, 0, 1] = -s
    rot[:, 1, 0] = s
    rot[:, 1, 1] = c
    return jnp.asarray(rot)


def affine_grid(theta, H, W):
    """torch.nn.functional.affine_grid, align_corners=False."""
    xs = (2.0 * jnp.arange(W, dtype=jnp.float32) + 1.0) / W - 1.0
    ys = (2.0 * jnp.arange(H, dtype=jnp.float32) + 1.0) / H - 1.0
    gx = (theta[:, 0, 0][:, None, None] * xs[None, None, :]
          + theta[:, 0, 1][:, None, None] * ys[None, :, None]
          + theta[:, 0, 2][:, None, None])
    gy = (theta[:, 1, 0][:, None, None] * xs[None, None, :]
          + theta[:, 1, 1][:, None, None] * ys[None, :, None]
          + theta[:, 1, 2][:, None, None])
    return gx, gy                                             # (B, H, W) each


def grid_sample_bilinear_zeros(imgs, gx, gy):
    """torch.nn.functional.grid_sample: bilinear, padding='zeros', align_corners=False."""
    B, C, H, W = imgs.shape
    ix = (gx + 1.0) * W * 0.5 - 0.5
    iy = (gy + 1.0) * H * 0.5 - 0.5
    ix0 = jnp.floor(ix)
    iy0 = jnp.floor(iy)

    def tap(iyf, ixf):
        valid = (ixf >= 0) & (ixf <= W - 1) & (iyf >= 0) & (iyf <= H - 1)
        ixc = jnp.clip(ixf, 0, W - 1).astype(jnp.int32)
        iyc = jnp.clip(iyf, 0, H - 1).astype(jnp.int32)

        def one(img, iy1, ix1, v1):
            return img[:, iy1, ix1] * v1[None].astype(img.dtype)

        return jax.vmap(one)(imgs, iyc, ixc, valid)

    wx1 = ix - ix0
    wx0 = 1.0 - wx1
    wy1 = iy - iy0
    wy0 = 1.0 - wy1
    out = (tap(iy0, ix0) * (wy0 * wx0)[:, None]
           + tap(iy0, ix0 + 1.0) * (wy0 * wx1)[:, None]
           + tap(iy0 + 1.0, ix0) * (wy1 * wx0)[:, None]
           + tap(iy0 + 1.0, ix0 + 1.0) * (wy1 * wx1)[:, None])
    return out


class ConvEq2dPallas:
    """JAX/Pallas port of the PyTorch ConvEq2d module (forward pass)."""

    def __init__(self, in_channels, out_channels, kernel_size=11, groups=1,
                 padding=0, key=None):
        self.in_channels = in_channels
        self.out_channels = out_channels
        self.rotations = 8
        self.groups = groups
        self.padding = padding
        self.kernel_size = kernel_size
        self.n_filters = int(in_channels * out_channels // (8 * groups))
        assert self.n_filters > 0

        # Deterministic xavier_uniform init with gain = calculate_gain('relu').
        fan_in = self.n_filters * kernel_size * kernel_size
        fan_out = 1 * kernel_size * kernel_size
        bound = math.sqrt(2.0) * math.sqrt(6.0 / (fan_in + fan_out))
        self.kernel = jax.random.uniform(
            key, (1, self.n_filters, kernel_size, kernel_size),
            jnp.float32, -bound, bound)

        # Circular mask (same formula as the torch module).
        c = int(kernel_size / 2)
        r = min(c, c, kernel_size - c, kernel_size - c)
        yy, xx = np.ogrid[:kernel_size, :kernel_size]
        self.mask = jnp.asarray(np.sqrt((xx - c) ** 2 + (yy - c) ** 2) <= r)

        self.rot_mats = make_rot_mats(self.rotations)

    def _update_kernels(self):
        K = self.kernel_size
        base = jnp.tile(self.kernel, (self.rotations, 1, 1, 1))   # (R, nf, K, K)
        gx, gy = affine_grid(self.rot_mats, K, K)
        rot = grid_sample_bilinear_zeros(base, gx, gy)            # (R, nf, K, K)
        rot = jnp.transpose(rot, (1, 0, 2, 3))                    # (nf, R, K, K)
        rot = jnp.where(self.mask[None, None, :, :], rot, 0.0)    # kernels[~mask] = 0
        return rot.reshape(self.out_channels,
                           self.in_channels // self.groups, K, K)

    def __call__(self, x):
        w = self._update_kernels()
        return conv2d_pallas(x, w, padding=self.padding, groups=self.groups)


if __name__ == "__main__":
    key = jax.random.PRNGKey(0)
    k_param, k_x = jax.random.split(key)

    # n_filters = in*out // (8*groups) must be > 0 -> pick in=4, out=8.
    in_channels, out_channels, kernel_size = 4, 8, 11
    module = ConvEq2dPallas(in_channels, out_channels, kernel_size,
                            groups=1, padding=0, key=k_param)

    x = jax.random.normal(k_x, (2, in_channels, 16, 16), jnp.float32)

    out = module(x)
    out = jax.block_until_ready(out)
    assert out.shape == (2, out_channels, 6, 6)

    # Pure-JAX reference conv for sanity.  The Pallas kernel runs bf16 operands
    # with f32 accumulation, so compare against a reference built from the same
    # bf16-rounded operands (exercises identical math, f32 accumulation).
    w = module._update_kernels()
    x_b = x.astype(jnp.bfloat16).astype(jnp.float32)
    w_b = w.astype(jnp.bfloat16).astype(jnp.float32)
    ref = jax.lax.conv_general_dilated(
        x_b, w_b, window_strides=(1, 1), padding="VALID",
        dimension_numbers=("NCHW", "OIHW", "NCHW"),
        precision=jax.lax.Precision.HIGHEST)
    np.testing.assert_allclose(np.asarray(out), np.asarray(ref),
                               rtol=2e-2, atol=2e-2)

    print("KERNEL_OK")
</pallas_src>

<mosaic_0001>
module attributes {stable_mosaic.version = 11 : i64} {
  func.func @_conv_mm_kernel(%arg0: i32, %arg1: i32, %arg2: memref<128x512xbf16, #tpu.memory_space<vmem>>, %arg3: memref<512x128xbf16, #tpu.memory_space<vmem>>, %arg4: memref<128x128xf32, #tpu.memory_space<vmem>>) attributes {dimension_semantics = [#tpu.dimension_semantics<parallel>, #tpu.dimension_semantics<arbitrary>], iteration_bounds = array<i64: 1, 1>, scalar_prefetch = 0 : i64, scratch_operands = 0 : i64, tpu.core_type = #tpu.core_type<tc>, window_params = [{transform_indices = @transform_0, window_bounds = array<i64: 128, 512>}, {transform_indices = @transform_1, window_bounds = array<i64: 512, 128>}, {transform_indices = @transform_2, window_bounds = array<i64: 128, 128>}]} {
    %c0_i32 = arith.constant 0 : i32
    %0 = arith.cmpi eq, %arg1, %c0_i32 : i32
    %1 = arith.extui %0 : i1 to i32
    %c0_i32_0 = arith.constant 0 : i32
    %2 = arith.cmpi ne, %1, %c0_i32_0 : i32
    scf.if %2 {
      %cst_8 = arith.constant 0.000000e+00 : f32
      %9 = vector.broadcast %cst_8 : f32 to vector<128x128xf32>
      %c0_9 = arith.constant 0 : index
      %c0_10 = arith.constant 0 : index
      %10 = vector.load %arg4[%c0_9, %c0_10] : memref<128x128xf32, #tpu.memory_space<vmem>>, vector<128x128xf32>
      tpu.vector_store %arg4[%c0_9, %c0_10], %9 {strides = array<i32>} : memref<128x128xf32, #tpu.memory_space<vmem>>, vector<128x128xf32>,
    } else {
    }
    %c0 = arith.constant 0 : index
    %c0_1 = arith.constant 0 : index
    %3 = vector.load %arg4[%c0, %c0_1] : memref<128x128xf32, #tpu.memory_space<vmem>>, vector<128x128xf32>
    %c0_2 = arith.constant 0 : index
    %c0_3 = arith.constant 0 : index
    %4 = vector.load %arg2[%c0_2, %c0_3] : memref<128x512xbf16, #tpu.memory_space<vmem>>, vector<128x512xbf16>
    %c0_4 = arith.constant 0 : index
    %c0_5 = arith.constant 0 : index
    %5 = vector.load %arg3[%c0_4, %c0_5] : memref<512x128xbf16, #tpu.memory_space<vmem>>, vector<512x128xbf16>
    %cst = arith.constant dense<0.000000e+00> : vector<128x128xf32>
    %6 = tpu.matmul %4, %5, %cst {dimension_numbers = #tpu.dot_dimension_numbers<[1], [0], [0], [1], [0, 0, 1, 1], [], []>} : vector<128x512xbf16>, vector<512x128xbf16>, vector<128x128xf32> -> vector<128x128xf32>
    %7 = arith.addf %3, %6 : vector<128x128xf32>
    %c0_6 = arith.constant 0 : index
    %c0_7 = arith.constant 0 : index
    %8 = vector.load %arg4[%c0_6, %c0_7] : memref<128x128xf32, #tpu.memory_space<vmem>>, vector<128x128xf32>
    tpu.vector_store %arg4[%c0_6, %c0_7], %7 {strides = array<i32>} : memref<128x128xf32, #tpu.memory_space<vmem>>, vector<128x128xf32>,
    return
  }
  func.func @transform_0(%arg0: i32, %arg1: i32) -> (i32, i32) {
    %c0_i32 = arith.constant 0 : i32
    return %arg0, %arg1 : i32, i32
  }
  func.func @transform_1(%arg0: i32, %arg1: i32) -> (i32, i32) {
    %c0_i32 = arith.constant 0 : i32
    %c0_i32_0 = arith.constant 0 : i32
    return %arg1, %c0_i32 : i32, i32
  }
  func.func @transform_2(%arg0: i32, %arg1: i32) -> (i32, i32) {
    %c0_i32 = arith.constant 0 : i32
    %c0_i32_0 = arith.constant 0 : i32
    return %arg0, %c0_i32 : i32, i32
  }
}

</mosaic_0001>

<bundles_post_ra>
// kernel: tpu_custom_call.1
= control target key start
LH: loop header
LB: loop body
LE: loop exit
PB: predicated region body
PF: predicated region fallthrough
CT: control target
= control target key end

     0   :  { %7 = vsyncpa [#allocation3], 0  ;;  %s1183_s0 = inlined_call_operand.hbm [shape: bf16[128,512], index: 0, kind: input, shape index: {}]   ;;  %s1184_s1 = inlined_call_operand.hbm [shape: bf16[512,128], index: 1, kind: input, shape index: {}]   ;;  %s1185_s2 = inlined_call_operand.hbm [shape: f32[128,128], index: 2, kind: output, shape index: {}]  }
   0x1   :  { %8 = vsyncpa [#allocation6], 0 }
   0x2   :  { %9 = vsyncpa [#allocation4], 0  ;;  %s1123_s9 = smov [#allocation2]   ;;  %s1051_s13 = scalar_lea.hbm %s1183_s0, 4096 }
   0x3   :  { %s15_s10 = sshll.u32 %s1123_s9, 4  ;;  %p1052_p0 = scmp.ne.s32.totalorder %s1183_s0, %s1051_s13  ;;  %s16_s10 = int_to_ptr.vmem [resolvable:$true] %s15_s10 }
   0x4   :  { %p1055_p1 = scmp.lt.u32.totalorder %s1051_s13, %s1183_s0 }
   0x6   :  { %p1057_p2 = pnand %p1055_p1, %p1052_p0 }
   0x8   :  { %1060 = shalt.err (!%p1057_p2)
}
   0x9   :  { %s1061_s18 = scalar_lea.vmem %s16_s10, 4096  ;;  %p1066_p4 = scmp.lt.s32.totalorder %s16_s10, %s16_s10 }
   0xa   :  { %p1062_p3 = scmp.ne.s32.totalorder %s16_s10, %s1061_s18  ;;  %p1067_p5 = scmp.lt.s32.totalorder %s1061_s18, %s1061_s18 }
   0xc   :  { %p1068_p6 = por %p1067_p5, %p1066_p4 }
   0xe   :  { %p1069_p7 = pnand %p1068_p6, %p1062_p3 }
  0x10   :  { %1072 = shalt.err (!%p1069_p7)
}
  0x11   :  { %s1124_s19 = smov 256   ;;  %s1125_s20 = smov 16  }
  0x12   :  { %21 = dma.hbm_to_vmem [thread:$0]  %s1183_s0, 4096, %s16_s10, [#allocation3], %s1124_s19, %s1124_s19, %s1125_s20  }
  0x13   :  { %s1126_s23 = smov [#allocation5]   ;;  %s1073_s27 = scalar_lea.hbm %s1184_s1, 4096 }
  0x14   :  { %s27_s24 = sshll.u32 %s1126_s23, 4  ;;  %p1074_p8 = scmp.ne.s32.totalorder %s1184_s1, %s1073_s27  ;;  %s28_s24 = int_to_ptr.vmem [resolvable:$true] %s27_s24 }
  0x15   :  { %p1077_p9 = scmp.lt.u32.totalorder %s1073_s27, %s1184_s1 }
  0x17   :  { %p1079_p10 = pnand %p1077_p9, %p1074_p8 }
  0x19   :  { %1082 = shalt.err (!%p1079_p10)
}
  0x1a   :  { %s1083_s4 = scalar_lea.vmem %s28_s24, 4096  ;;  %p1088_p12 = scmp.lt.s32.totalorder %s28_s24, %s28_s24 }
  0x1b   :  { %p1084_p11 = scmp.ne.s32.totalorder %s28_s24, %s1083_s4  ;;  %p1089_p13 = scmp.lt.s32.totalorder %s1083_s4, %s1083_s4 }
  0x1d   :  { %p1090_p0 = por %p1089_p13, %p1088_p12 }
  0x1f   :  { %p1091_p1 = pnand %p1090_p0, %p1084_p11 }
  0x21   :  { %1094 = shalt.err (!%p1091_p1)
}
  0x22   :  { %s1127_s0 = smov 64   ;;  %s1128_s5 = smov 4  }
  0x23   :  { %33 = dma.hbm_to_vmem [thread:$0]  %s1184_s1, 4096, %s28_s24, [#allocation6], %s1127_s0, %s1127_s0, %s1128_s5  }
  0x24   :  { %1117 = dma.done.wait [#allocation3], 4096  }
  0x25   :  { %1118 = vsyncadd [#allocation3], 4294963200 }
  0x26   :  { %1119 = dma.done.wait [#allocation6], 4096  }
  0x27   :  { %1120 = vsyncadd [#allocation6], 4294963200  ;;  %v971_v0 = vld [vmem:[#allocation5 + $0x40] sm:$0xff]   ;;  %v975_v4 = vld [vmem:[#allocation5 + $0x48] sm:$0xff]   ;;  %s1129_s1 = smov [#allocation7]  }
  0x28   :  { %v972_v1 = vld [vmem:[#allocation5 + $0xc0] sm:$0xff]   ;;  %833 = vmatprep.subr.bf16.mxu0 %v971_v0  ;;  %v976_v5 = vld [vmem:[#allocation5 + $0xc8] sm:$0xff]   ;;  %v979_v8 = vld [vmem:[#allocation5 + $0x50] sm:$0xff]   ;;  %s756_s8 = sshll.u32 %s1129_s1, 4  ;;  %s757_s8 = int_to_ptr.vmem [resolvable:$true] %s756_s8 }
  0x29   :  { %v973_v2 = vld [vmem:[#allocation5] sm:$0xff]   ;;  %897 = vmatprep.subr.bf16.mxu1 %v972_v1  ;;  %v977_v6 = vld [vmem:[#allocation5 + $0x8] sm:$0xff]   ;;  %v980_v9 = vld [vmem:[#allocation5 + $0xd0] sm:$0xff]   ;;  %s1095_s9 = scalar_lea.vmem %s757_s8, 2048  ;;  %p1100_p3 = scmp.lt.s32.totalorder %s757_s8, %s757_s8 }
  0x2a   :  { %v974_v3 = vld [vmem:[#allocation5 + $0x80] sm:$0xff]   ;;  %834 = vmatpush3.bf16.msra.mxu0 %v973_v2  ;;  %v978_v7 = vld [vmem:[#allocation5 + $0x88] sm:$0xff]   ;;  %v981_v10 = vld [vmem:[#allocation5 + $0x10] sm:$0xff]   ;;  %p1096_p2 = scmp.ne.s32.totalorder %s757_s8, %s1095_s9  ;;  %p1101_p4 = scmp.lt.s32.totalorder %s1095_s9, %s1095_s9 }
  0x2b   :  { %898 = vmatpush3.bf16.msra.mxu1 %v974_v3  ;;  %835 = vmatprep.subr.bf16.mxu0 %v975_v4  ;;  %v982_v11 = vld [vmem:[#allocation5 + $0x90] sm:$0xff]   ;;  %v983_v12 = vld [vmem:[#allocation5 + $0x58] sm:$0xff]   ;;  %v987_v16 = vld [vmem:[#allocation5 + $0x60] sm:$0xff]  }
  0x2c   :  { %899 = vmatprep.subr.bf16.mxu1 %v976_v5  ;;  %v984_v13 = vld [vmem:[#allocation5 + $0xd8] sm:$0xff]   ;;  %v988_v17 = vld [vmem:[#allocation5 + $0xe0] sm:$0xff]   ;;  %v991_v20 = vld [vmem:[#allocation5 + $0x68] sm:$0xff]   ;;  %p1102_p5 = por %p1101_p4, %p1100_p3 }
  0x2d   :  { %v985_v14 = vld [vmem:[#allocation5 + $0x18] sm:$0xff]   ;;  %v989_v18 = vld [vmem:[#allocation5 + $0x20] sm:$0xff]   ;;  %v992_v21 = vld [vmem:[#allocation5 + $0xe8] sm:$0xff]  }
  0x2e   :  { %836 = vmatpush3.bf16.msra.mxu0 %v977_v6  ;;  %v986_v15 = vld [vmem:[#allocation5 + $0x98] sm:$0xff]   ;;  %v990_v19 = vld [vmem:[#allocation5 + $0xa0] sm:$0xff]   ;;  %v993_v22 = vld [vmem:[#allocation5 + $0x28] sm:$0xff]   ;;  %p1103_p6 = pnand %p1102_p5, %p1096_p2 }
  0x2f   :  { %900 = vmatpush3.bf16.msra.mxu1 %v978_v7  ;;  %837 = vmatprep.subr.bf16.mxu0 %v979_v8  ;;  %v994_v23 = vld [vmem:[#allocation5 + $0xa8] sm:$0xff]   ;;  %v995_v24 = vld [vmem:[#allocation5 + $0x70] sm:$0xff]   ;;  %v999_v28 = vld [vmem:[#allocation5 + $0x78] sm:$0xff]  }
  0x30   :  { %901 = vmatprep.subr.bf16.mxu1 %v980_v9  ;;  %v996_v25 = vld [vmem:[#allocation5 + $0xf0] sm:$0xff]   ;;  %v1000_v29 = vld [vmem:[#allocation5 + $0xf8] sm:$0xff]  }
  0x31   :  { %v997_v26 = vld [vmem:[#allocation5 + $0x30] sm:$0xff]   ;;  %v1001_v30 = vld [vmem:[#allocation5 + $0x38] sm:$0xff]  }
  0x32   :  { %838 = vmatpush3.bf16.msra.mxu0 %v981_v10  ;;  %v998_v27 = vld [vmem:[#allocation5 + $0xb0] sm:$0xff]   ;;  %v1002_v31 = vld [vmem:[#allocation5 + $0xb8] sm:$0xff]  }
  0x33   :  { %902 = vmatpush3.bf16.msra.mxu1 %v982_v11  ;;  %839 = vmatprep.subr.bf16.mxu0 %v983_v12  ;;  %v1003_v32 = vld [vmem:[#allocation2] ss:$16 sps:$4 sm:$0xff]   ;;  %v1005_v33 = vld [vmem:[#allocation2 + $0x4] ss:$16 sps:$4 sm:$0xff]   ;;  %v1006_v34 = vld [vmem:[#allocation2 + $0x8] ss:$16 sps:$4 sm:$0xff]  }
  0x34   :  { %903 = vmatprep.subr.bf16.mxu1 %v984_v13  ;;  %v1008_v35 = vld [vmem:[#allocation2 + $0xc] ss:$16 sps:$4 sm:$0xff]   ;;  %557 = vmatprep.mubr.bf16.mxu0 %v1005_v33  ;;  %v1009_v36 = vld [vmem:[#allocation2 + $0x24] ss:$16 sps:$4 sm:$0xff]   ;;  %v1013_v38 = vld [vmem:[#allocation2 + $0x20] ss:$16 sps:$4 sm:$0xff]  }
  0x35   :  { %654 = vmatprep.mubr.bf16.mxu1 %v1008_v35  ;;  %v1011_v37 = vld [vmem:[#allocation2 + $0x2c] ss:$16 sps:$4 sm:$0xff]   ;;  %v1014_v39 = vld [vmem:[#allocation2 + $0x28] ss:$16 sps:$4 sm:$0xff]   ;;  %v1015_v40 = vld [vmem:[#allocation2 + $0x44] ss:$16 sps:$4 sm:$0xff]  }
  0x36   :  { %840 = vmatpush3.bf16.msra.mxu0 %v985_v14  ;;  %v1017_v41 = vld [vmem:[#allocation2 + $0x4c] ss:$16 sps:$4 sm:$0xff]   ;;  %v1019_v42 = vld [vmem:[#allocation2 + $0x40] ss:$16 sps:$4 sm:$0xff]   ;;  %v1020_v43 = vld [vmem:[#allocation2 + $0x48] ss:$16 sps:$4 sm:$0xff]  }
  0x37   :  { %904 = vmatpush3.bf16.msra.mxu1 %v986_v15  ;;  %841 = vmatprep.subr.bf16.mxu0 %v987_v16  ;;  %v1021_v44 = vld [vmem:[#allocation2 + $0x64] ss:$16 sps:$4 sm:$0xff]   ;;  %v1023_v45 = vld [vmem:[#allocation2 + $0x6c] ss:$16 sps:$4 sm:$0xff]   ;;  %v1025_v46 = vld [vmem:[#allocation2 + $0x60] ss:$16 sps:$4 sm:$0xff]  }
  0x38   :  { %905 = vmatprep.subr.bf16.mxu1 %v988_v17  ;;  %v1026_v47 = vld [vmem:[#allocation2 + $0x68] ss:$16 sps:$4 sm:$0xff]   ;;  %v1027_v48 = vld [vmem:[#allocation2 + $0x84] ss:$16 sps:$4 sm:$0xff]   ;;  %v1029_v49 = vld [vmem:[#allocation2 + $0x8c] ss:$16 sps:$4 sm:$0xff]  }
  0x39   :  { %v1031_v50 = vld [vmem:[#allocation2 + $0x80] ss:$16 sps:$4 sm:$0xff]   ;;  %v1032_v51 = vld [vmem:[#allocation2 + $0x88] ss:$16 sps:$4 sm:$0xff]   ;;  %v1033_v52 = vld [vmem:[#allocation2 + $0xa4] ss:$16 sps:$4 sm:$0xff]  }
  0x3a   :  { %842 = vmatpush3.bf16.msra.mxu0 %v989_v18  ;;  %v1035_v53 = vld [vmem:[#allocation2 + $0xac] ss:$16 sps:$4 sm:$0xff]   ;;  %v1037_v54 = vld [vmem:[#allocation2 + $0xa0] ss:$16 sps:$4 sm:$0xff]   ;;  %v1038_v55 = vld [vmem:[#allocation2 + $0xa8] ss:$16 sps:$4 sm:$0xff]  }
  0x3b   :  { %906 = vmatpush3.bf16.msra.mxu1 %v990_v19  ;;  %843 = vmatprep.subr.bf16.mxu0 %v991_v20  ;;  %v1039_v56 = vld [vmem:[#allocation2 + $0xc4] ss:$16 sps:$4 sm:$0xff]   ;;  %v1041_v57 = vld [vmem:[#allocation2 + $0xcc] ss:$16 sps:$4 sm:$0xff]   ;;  %v1043_v58 = vld [vmem:[#allocation2 + $0xc0] ss:$16 sps:$4 sm:$0xff]  }
  0x3c   :  { %907 = vmatprep.subr.bf16.mxu1 %v992_v21  ;;  %v1044_v59 = vld [vmem:[#allocation2 + $0xc8] ss:$16 sps:$4 sm:$0xff]   ;;  %v1045_v60 = vld [vmem:[#allocation2 + $0xe4] ss:$16 sps:$4 sm:$0xff]   ;;  %v1047_v61 = vld [vmem:[#allocation2 + $0xec] ss:$16 sps:$4 sm:$0xff]  }
  0x3d   :  { %v1049_v62 = vld [vmem:[#allocation2 + $0xe0] ss:$16 sps:$4 sm:$0xff]   ;;  %v1050_v63 = vld [vmem:[#allocation2 + $0xe8] ss:$16 sps:$4 sm:$0xff]  }
  0x3e   :  { %844 = vmatpush3.bf16.msra.mxu0 %v993_v22 }
  0x3f   :  { %908 = vmatpush3.bf16.msra.mxu1 %v994_v23  ;;  %845 = vmatprep.subr.bf16.mxu0 %v995_v24 }
  0x40   :  { %909 = vmatprep.subr.bf16.mxu1 %v996_v25 }
  0x42   :  { %846 = vmatpush3.bf16.msra.mxu0 %v997_v26 }
  0x43   :  { %910 = vmatpush3.bf16.msra.mxu1 %v998_v27  ;;  %847 = vmatprep.subr.bf16.mxu0 %v999_v28 }
  0x44   :  { %911 = vmatprep.subr.bf16.mxu1 %v1000_v29 }
  0x46   :  { %848 = vmatpush3.bf16.msra.mxu0 %v1001_v30 }
  0x47   :  { %912 = vmatpush3.bf16.msra.mxu1 %v1002_v31 }
  0x49   :  { %558 = vmatmul.mubr.bf16.vlgmr.msra.gmra.mrb[0].mxu0 %v1003_v32 }
  0x4a   :  { %655 = vmatmul.mubr.bf16.vlgmr.msra.gmra.mrb[0].mxu1 %v1006_v34  ;;  %565 = vmatprep.mubr.bf16.mxu0 %v1009_v36 }
  0x4b   :  { %662 = vmatprep.mubr.bf16.mxu1 %v1011_v37 }
  0x51   :  { %566 = vmatmul.mubr.bf16.gmra.mrb[4].mxu0 %v1013_v38 }
  0x52   :  { %663 = vmatmul.mubr.bf16.gmra.mrb[4].mxu1 %v1014_v39  ;;  %573 = vmatprep.mubr.bf16.mxu0 %v1015_v40 }
  0x53   :  { %670 = vmatprep.mubr.bf16.mxu1 %v1017_v41 }
  0x59   :  { %574 = vmatmul.mubr.bf16.gmra.mrb[8].mxu0 %v1019_v42 }
  0x5a   :  { %671 = vmatmul.mubr.bf16.gmra.mrb[8].mxu1 %v1020_v43  ;;  %581 = vmatprep.mubr.bf16.mxu0 %v1021_v44 }
  0x5b   :  { %678 = vmatprep.mubr.bf16.mxu1 %v1023_v45 }
  0x61   :  { %582 = vmatmul.mubr.bf16.gmra.mrb[12].mxu0 %v1025_v46 }
  0x62   :  { %679 = vmatmul.mubr.bf16.gmra.mrb[12].mxu1 %v1026_v47  ;;  %589 = vmatprep.mubr.bf16.mxu0 %v1027_v48 }
  0x63   :  { %686 = vmatprep.mubr.bf16.mxu1 %v1029_v49 }
  0x69   :  { %590 = vmatmul.mubr.bf16.gmra.mrb[16].mxu0 %v1031_v50 }
  0x6a   :  { %687 = vmatmul.mubr.bf16.gmra.mrb[16].mxu1 %v1032_v51  ;;  %597 = vmatprep.mubr.bf16.mxu0 %v1033_v52 }
  0x6b   :  { %694 = vmatprep.mubr.bf16.mxu1 %v1035_v53 }
  0x71   :  { %598 = vmatmul.mubr.bf16.gmra.mrb[20].mxu0 %v1037_v54 }
  0x72   :  { %695 = vmatmul.mubr.bf16.gmra.mrb[20].mxu1 %v1038_v55  ;;  %605 = vmatprep.mubr.bf16.mxu0 %v1039_v56 }
  0x73   :  { %702 = vmatprep.mubr.bf16.mxu1 %v1041_v57 }
  0x79   :  { %606 = vmatmul.mubr.bf16.gmra.mrb[24].mxu0 %v1043_v58 }
  0x7a   :  { %703 = vmatmul.mubr.bf16.gmra.mrb[24].mxu1 %v1044_v59  ;;  %613 = vmatprep.mubr.bf16.mxu0 %v1045_v60 }
  0x7b   :  { %710 = vmatprep.mubr.bf16.mxu1 %v1047_v61 }
  0x81   :  { %614 = vmatmul.mubr.bf16.gmra.mrb[28].mxu0 %v1049_v62 }
  0x82   :  { %711 = vmatmul.mubr.bf16.gmra.mrb[28].mxu1 %v1050_v63 }
 0x11c   :  { %v849_v0 = vpop.f32.mrb[0].mxu0 }
 0x11d   :  { %v913_v1 = vpop.f32.mrb[0].mxu1  ;;  %v850_v2 = vpop.f32.mrb[1].mxu0 }
 0x11e   :  { %v851_v3 = vadd.f32 %v850_v2, %v849_v0  ;;  %v914_v4 = vpop.f32.mrb[1].mxu1  ;;  %v852_v5 = vpop.f32.mrb[2].mxu0 }
 0x11f   :  { %v915_v6 = vadd.f32 %v914_v4, %v913_v1  ;;  %v916_v7 = vpop.f32.mrb[2].mxu1  ;;  %v853_v8 = vpop.f32.mrb[3].mxu0 }
 0x120   :  { %v854_v9 = vadd.f32 %v853_v8, %v852_v5  ;;  %v917_v10 = vpop.f32.mrb[3].mxu1 }
 0x121   :  { %v657_v11 = vadd.f32 %v915_v6, %v851_v3  ;;  %v918_v12 = vadd.f32 %v917_v10, %v916_v7 }
 0x123   :  { %v660_v13 = vadd.f32 %v918_v12, %v854_v9  ;;  %735 = vst [vmem:[#allocation7] sm:$0xff] %v657_v11 }
 0x124   :  { %v855_v14 = vpop.f32.mrb[4].mxu0 }
 0x125   :  { %v919_v15 = vpop.f32.mrb[4].mxu1  ;;  %v856_v16 = vpop.f32.mrb[5].mxu0  ;;  %736 = vst [vmem:[#allocation7 + $0x8] sm:$0xff] %v660_v13 }
 0x126   :  { %v857_v17 = vadd.f32 %v856_v16, %v855_v14  ;;  %v920_v18 = vpop.f32.mrb[5].mxu1  ;;  %v858_v19 = vpop.f32.mrb[6].mxu0 }
 0x127   :  { %v921_v20 = vadd.f32 %v920_v18, %v919_v15  ;;  %v922_v21 = vpop.f32.mrb[6].mxu1  ;;  %v859_v22 = vpop.f32.mrb[7].mxu0 }
 0x128   :  { %v860_v23 = vadd.f32 %v859_v22, %v858_v19  ;;  %v923_v24 = vpop.f32.mrb[7].mxu1 }
 0x129   :  { %v665_v25 = vadd.f32 %v921_v20, %v857_v17  ;;  %v924_v26 = vadd.f32 %v923_v24, %v922_v21 }
 0x12b   :  { %v668_v27 = vadd.f32 %v924_v26, %v860_v23  ;;  %737 = vst [vmem:[#allocation7 + $0x10] sm:$0xff] %v665_v25 }
 0x12c   :  { %v861_v28 = vpop.f32.mrb[8].mxu0 }
 0x12d   :  { %v925_v29 = vpop.f32.mrb[8].mxu1  ;;  %v862_v30 = vpop.f32.mrb[9].mxu0  ;;  %738 = vst [vmem:[#allocation7 + $0x18] sm:$0xff] %v668_v27 }
 0x12e   :  { %v863_v31 = vadd.f32 %v862_v30, %v861_v28  ;;  %v926_v32 = vpop.f32.mrb[9].mxu1  ;;  %v864_v33 = vpop.f32.mrb[10].mxu0 }
 0x12f   :  { %v927_v34 = vadd.f32 %v926_v32, %v925_v29  ;;  %v928_v35 = vpop.f32.mrb[10].mxu1  ;;  %v865_v36 = vpop.f32.mrb[11].mxu0 }
 0x130   :  { %v866_v37 = vadd.f32 %v865_v36, %v864_v33  ;;  %v929_v38 = vpop.f32.mrb[11].mxu1 }
 0x131   :  { %v673_v39 = vadd.f32 %v927_v34, %v863_v31  ;;  %v930_v40 = vadd.f32 %v929_v38, %v928_v35 }
 0x133   :  { %v676_v41 = vadd.f32 %v930_v40, %v866_v37  ;;  %739 = vst [vmem:[#allocation7 + $0x20] sm:$0xff] %v673_v39 }
 0x134   :  { %v867_v42 = vpop.f32.mrb[12].mxu0 }
 0x135   :  { %v931_v43 = vpop.f32.mrb[12].mxu1  ;;  %v868_v44 = vpop.f32.mrb[13].mxu0  ;;  %740 = vst [vmem:[#allocation7 + $0x28] sm:$0xff] %v676_v41 }
 0x136   :  { %v869_v45 = vadd.f32 %v868_v44, %v867_v42  ;;  %v932_v46 = vpop.f32.mrb[13].mxu1  ;;  %v870_v47 = vpop.f32.mrb[14].mxu0 }
 0x137   :  { %v933_v48 = vadd.f32 %v932_v46, %v931_v43  ;;  %v934_v49 = vpop.f32.mrb[14].mxu1  ;;  %v871_v50 = vpop.f32.mrb[15].mxu0 }
 0x138   :  { %v872_v51 = vadd.f32 %v871_v50, %v870_v47  ;;  %v935_v52 = vpop.f32.mrb[15].mxu1 }
 0x139   :  { %v681_v53 = vadd.f32 %v933_v48, %v869_v45  ;;  %v936_v54 = vadd.f32 %v935_v52, %v934_v49 }
 0x13b   :  { %v684_v55 = vadd.f32 %v936_v54, %v872_v51  ;;  %741 = vst [vmem:[#allocation7 + $0x30] sm:$0xff] %v681_v53 }
 0x13c   :  { %v873_v56 = vpop.f32.mrb[16].mxu0 }
 0x13d   :  { %v937_v57 = vpop.f32.mrb[16].mxu1  ;;  %v874_v58 = vpop.f32.mrb[17].mxu0  ;;  %742 = vst [vmem:[#allocation7 + $0x38] sm:$0xff] %v684_v55 }
 0x13e   :  { %v875_v59 = vadd.f32 %v874_v58, %v873_v56  ;;  %v938_v60 = vpop.f32.mrb[17].mxu1  ;;  %v876_v61 = vpop.f32.mrb[18].mxu0 }
 0x13f   :  { %v939_v62 = vadd.f32 %v938_v60, %v937_v57  ;;  %v940_v63 = vpop.f32.mrb[18].mxu1  ;;  %v877_v0 = vpop.f32.mrb[19].mxu0 }
 0x140   :  { %v878_v1 = vadd.f32 %v877_v0, %v876_v61  ;;  %v941_v2 = vpop.f32.mrb[19].mxu1 }
 0x141   :  { %v689_v3 = vadd.f32 %v939_v62, %v875_v59  ;;  %v942_v4 = vadd.f32 %v941_v2, %v940_v63 }
 0x143   :  { %v692_v5 = vadd.f32 %v942_v4, %v878_v1  ;;  %743 = vst [vmem:[#allocation7 + $0x40] sm:$0xff] %v689_v3 }
 0x144   :  { %v879_v6 = vpop.f32.mrb[20].mxu0 }
 0x145   :  { %v943_v7 = vpop.f32.mrb[20].mxu1  ;;  %v880_v8 = vpop.f32.mrb[21].mxu0  ;;  %744 = vst [vmem:[#allocation7 + $0x48] sm:$0xff] %v692_v5 }
 0x146   :  { %v881_v9 = vadd.f32 %v880_v8, %v879_v6  ;;  %v944_v10 = vpop.f32.mrb[21].mxu1  ;;  %v882_v11 = vpop.f32.mrb[22].mxu0 }
 0x147   :  { %v945_v12 = vadd.f32 %v944_v10, %v943_v7  ;;  %v946_v13 = vpop.f32.mrb[22].mxu1  ;;  %v883_v14 = vpop.f32.mrb[23].mxu0 }
 0x148   :  { %v884_v15 = vadd.f32 %v883_v14, %v882_v11  ;;  %v947_v16 = vpop.f32.mrb[23].mxu1 }
 0x149   :  { %v697_v17 = vadd.f32 %v945_v12, %v881_v9  ;;  %v948_v18 = vadd.f32 %v947_v16, %v946_v13 }
 0x14b   :  { %v700_v19 = vadd.f32 %v948_v18, %v884_v15  ;;  %745 = vst [vmem:[#allocation7 + $0x50] sm:$0xff] %v697_v17 }
 0x14c   :  { %v885_v20 = vpop.f32.mrb[24].mxu0 }
 0x14d   :  { %v949_v21 = vpop.f32.mrb[24].mxu1  ;;  %v886_v22 = vpop.f32.mrb[25].mxu0  ;;  %746 = vst [vmem:[#allocation7 + $0x58] sm:$0xff] %v700_v19 }
 0x14e   :  { %v887_v23 = vadd.f32 %v886_v22, %v885_v20  ;;  %v950_v24 = vpop.f32.mrb[25].mxu1  ;;  %v888_v25 = vpop.f32.mrb[26].mxu0 }
 0x14f   :  { %v951_v26 = vadd.f32 %v950_v24, %v949_v21  ;;  %v952_v27 = vpop.f32.mrb[26].mxu1  ;;  %v889_v28 = vpop.f32.mrb[27].mxu0 }
 0x150   :  { %v890_v29 = vadd.f32 %v889_v28, %v888_v25  ;;  %v953_v30 = vpop.f32.mrb[27].mxu1 }
 0x151   :  { %v705_v31 = vadd.f32 %v951_v26, %v887_v23  ;;  %v954_v32 = vadd.f32 %v953_v30, %v952_v27 }
 0x153   :  { %v708_v33 = vadd.f32 %v954_v32, %v890_v29  ;;  %747 = vst [vmem:[#allocation7 + $0x60] sm:$0xff] %v705_v31 }
 0x154   :  { %v891_v34 = vpop.f32.mrb[28].mxu0 }
 0x155   :  { %v955_v35 = vpop.f32.mrb[28].mxu1  ;;  %v892_v36 = vpop.f32.mrb[29].mxu0  ;;  %748 = vst [vmem:[#allocation7 + $0x68] sm:$0xff] %v708_v33 }
 0x156   :  { %v893_v37 = vadd.f32 %v892_v36, %v891_v34  ;;  %v956_v38 = vpop.f32.mrb[29].mxu1  ;;  %v894_v39 = vpop.f32.mrb[30].mxu0 }
 0x157   :  { %v957_v40 = vadd.f32 %v956_v38, %v955_v35  ;;  %v958_v41 = vpop.f32.mrb[30].mxu1  ;;  %v895_v42 = vpop.f32.mrb[31].mxu0 }
 0x158   :  { %v896_v43 = vadd.f32 %v895_v42, %v894_v39  ;;  %v959_v44 = vpop.f32.mrb[31].mxu1 }
 0x159   :  { %v713_v45 = vadd.f32 %v957_v40, %v893_v37  ;;  %v960_v46 = vadd.f32 %v959_v44, %v958_v41 }
 0x15b   :  { %v716_v47 = vadd.f32 %v960_v46, %v896_v43  ;;  %749 = vst [vmem:[#allocation7 + $0x70] sm:$0xff] %v713_v45 }
 0x15d   :  { %750 = vst [vmem:[#allocation7 + $0x78] sm:$0xff] %v716_v47 }
 0x15e   :  { %1106 = shalt.err (!%p1103_p6)
}
 0x15f   :  { %s1107_s12 = scalar_lea.hbm %s1185_s2, 2048 }
 0x160   :  { %p1108_p7 = scmp.ne.s32.totalorder %s1185_s2, %s1107_s12  ;;  %p1111_p8 = scmp.lt.u32.totalorder %s1107_s12, %s1185_s2 }
 0x162   :  { %p1113_p9 = pnand %p1111_p8, %p1108_p7 }
 0x164   :  { %1116 = shalt.err (!%p1113_p9)
}
 0x165   :  { %s1130_s17 = smov 128   ;;  %s1131_s18 = smov 8  }
 0x166   :  { %762 = dma.vmem_to_hbm [thread:$0]  %s757_s8, 2048, %s1185_s2, [#allocation4], %s1130_s17, %s1130_s17, %s1131_s18  }
 0x167   :  { %1121 = dma.done.wait [#allocation4], 2048  }
 0x168   :  { %1122 = vsyncadd [#allocation4], 4294965248 }
 0x169   :  { %766 = vsyncpa [#allocation3], 1 }
 0x16a   :  { %767 = vsyncpa [#allocation6], 1 }
 0x16b   :  { %768 = vsyncpa [#allocation4], 1 }

</bundles_post_ra>
